<compile_context>
chip_gen: v7x
topology: tpu7x:2x2x1
jax: 0.10.0
libtpu: 0.0.40
codegen_flags: <defaults>
</compile_context>

<pallas_src>
import functools

import jax
import jax.numpy as jnp
from jax import lax
from jax.experimental import pallas as pl
from jax.experimental.pallas import tpu as pltpu

_LANES = 128
_SUBLANES = 8
# 4096 rows x 128 lanes x 4 B = 2 MiB per input per block; x2 inputs x2
# pipeline buffers = 8 MiB, safe under the default scoped-VMEM limit on
# v5e (16 MiB), v6e (32 MiB) and v7x (32 MiB).
_TARGET_BLOCK_ROWS = 4096


def _dice_kernel(x_ref, t_ref, o_ref, acc_prod, acc_st, *,
                 smooth, n_valid, block_rows, needs_mask):
    """Accumulate per-lane partial sums; reduce + emit the loss on the last step.

    acc_prod (VMEM, (8,128) f32): per-lane partial sums of sigmoid(x) * t
    acc_st   (VMEM, (8,128) f32): per-lane partial sums of sigmoid(x) + t
    """
    i = pl.program_id(0)

    @pl.when(i == 0)
    def _init():
        acc_prod[...] = jnp.zeros_like(acc_prod)
        acc_st[...] = jnp.zeros_like(acc_st)

    x = x_ref[...].astype(jnp.float32)
    t = t_ref[...].astype(jnp.float32)
    s = jax.nn.sigmoid(x)

    if needs_mask:
        # Mask out anything past the true element count (tail of the last,
        # partial block and/or the <128-element lane pad).
        row = lax.broadcasted_iota(jnp.int32, x.shape, 0)
        lane = lax.broadcasted_iota(jnp.int32, x.shape, 1)
        flat_idx = (i * block_rows + row) * _LANES + lane
        valid = flat_idx < n_valid
        s = jnp.where(valid, s, 0.0)
        t = jnp.where(valid, t, 0.0)

    prod = s * t
    st = s + t
    # Fold the block's rows down to a single (8,128) vreg: pure VPU adds,
    # no cross-lane work per step.
    acc_prod[...] += jnp.sum(prod.reshape(-1, _SUBLANES, _LANES), axis=0)
    acc_st[...] += jnp.sum(st.reshape(-1, _SUBLANES, _LANES), axis=0)

    @pl.when(i == pl.num_programs(0) - 1)
    def _finalize():
        intersection = jnp.sum(acc_prod[...])
        denom = jnp.sum(acc_st[...]) + smooth
        dice = (2.0 * intersection + smooth) / denom
        o_ref[...] = jnp.full((1, 1), 1.0 - dice, dtype=jnp.float32)


def dice_loss(inputs, targets, smooth=1.0):
    """Pallas TPU implementation of DiceLoss.forward (returns an f32 scalar)."""
    n = int(inputs.size)
    x = jnp.reshape(inputs, (-1,))
    t = jnp.reshape(targets, (-1,))

    # Only a tiny (<128 element) pad when n is not lane-aligned; the padded
    # values are masked out inside the kernel, so the pad value is irrelevant.
    pad = (-n) % _LANES
    if pad:
        x = jnp.pad(x, (0, pad))
        t = jnp.pad(t, (0, pad))

    rows = (n + pad) // _LANES
    x2 = x.reshape(rows, _LANES)   # original dtype; upcast happens in-kernel
    t2 = t.reshape(rows, _LANES)

    rows8 = ((rows + _SUBLANES - 1) // _SUBLANES) * _SUBLANES
    block_rows = min(_TARGET_BLOCK_ROWS, rows8)   # multiple of 8 by construction
    num_blocks = pl.cdiv(rows, block_rows)
    needs_mask = (num_blocks * block_rows * _LANES) != n

    kernel = functools.partial(
        _dice_kernel,
        smooth=float(smooth),
        n_valid=n,
        block_rows=block_rows,
        needs_mask=needs_mask,
    )

    out = pl.pallas_call(
        kernel,
        out_shape=jax.ShapeDtypeStruct((1, 1), jnp.float32),
        grid_spec=pltpu.PrefetchScalarGridSpec(
            num_scalar_prefetch=0,
            grid=(num_blocks,),
            in_specs=[
                pl.BlockSpec((block_rows, _LANES), lambda i: (i, 0)),
                pl.BlockSpec((block_rows, _LANES), lambda i: (i, 0)),
            ],
            out_specs=pl.BlockSpec((1, 1), lambda i: (0, 0)),
            scratch_shapes=[
                pltpu.VMEM((_SUBLANES, _LANES), jnp.float32),
                pltpu.VMEM((_SUBLANES, _LANES), jnp.float32),
            ],
        ),
        compiler_params=pltpu.CompilerParams(
            dimension_semantics=("arbitrary",)),
    )(x2, t2)
    return out[0, 0]


def _dice_loss_ref(inputs, targets, smooth=1.0):
    s = jax.nn.sigmoid(inputs.astype(jnp.float32)).reshape(-1)
    t = targets.astype(jnp.float32).reshape(-1)
    inter = jnp.sum(s * t)
    dice = (2.0 * inter + smooth) / (jnp.sum(s) + jnp.sum(t) + smooth)
    return 1.0 - dice


if __name__ == "__main__":
    key = jax.random.PRNGKey(0)
    k1, k2 = jax.random.split(key)
    # Small shape consistent with a segmentation head: (B, C, H, W)
    x = jax.random.normal(k1, (2, 4, 16, 16), dtype=jnp.float32)
    tgt = (jax.random.uniform(k2, (2, 4, 16, 16)) > 0.5).astype(jnp.float32)

    loss = jax.block_until_ready(dice_loss(x, tgt))
    ref = jax.block_until_ready(_dice_loss_ref(x, tgt))
    assert jnp.allclose(loss, ref, atol=1e-5, rtol=1e-5), (loss, ref)
    print("KERNEL_OK")
</pallas_src>

<mosaic_0001>
module attributes {stable_mosaic.version = 11 : i64} {
  func.func @_dice_kernel(%arg0: i32, %arg1: memref<16x128xf32, #tpu.memory_space<vmem>>, %arg2: memref<16x128xf32, #tpu.memory_space<vmem>>, %arg3: memref<1x1xf32, #tpu.memory_space<vmem>>, %arg4: memref<8x128xf32, #tpu.memory_space<vmem>>, %arg5: memref<8x128xf32, #tpu.memory_space<vmem>>) attributes {dimension_semantics = [#tpu.dimension_semantics<arbitrary>], iteration_bounds = array<i64: 1>, scalar_prefetch = 0 : i64, scratch_operands = 2 : i64, tpu.core_type = #tpu.core_type<tc>, window_params = [{transform_indices = @transform_0, window_bounds = array<i64: 16, 128>}, {transform_indices = @transform_1, window_bounds = array<i64: 16, 128>}, {pipeline_mode = #tpu.pipeline_mode<synchronous>, transform_indices = @transform_2, window_bounds = array<i64: 1, 1>}]} {
    %c0_i32 = arith.constant 0 : i32
    %0 = arith.cmpi eq, %arg0, %c0_i32 : i32
    %1 = arith.extui %0 : i1 to i32
    %c0_i32_0 = arith.constant 0 : i32
    %2 = arith.cmpi ne, %1, %c0_i32_0 : i32
    scf.if %2 {
      %cst_16 = arith.constant 0.000000e+00 : f32
      %25 = vector.broadcast %cst_16 : f32 to vector<8x128xf32>
      %c0_17 = arith.constant 0 : index
      %c0_18 = arith.constant 0 : index
      %26 = vector.load %arg4[%c0_17, %c0_18] : memref<8x128xf32, #tpu.memory_space<vmem>>, vector<8x128xf32>
      tpu.vector_store %arg4[%c0_17, %c0_18], %25 {strides = array<i32>} : memref<8x128xf32, #tpu.memory_space<vmem>>, vector<8x128xf32>,
      %cst_19 = arith.constant 0.000000e+00 : f32
      %27 = vector.broadcast %cst_19 : f32 to vector<8x128xf32>
      %c0_20 = arith.constant 0 : index
      %c0_21 = arith.constant 0 : index
      %28 = vector.load %arg5[%c0_20, %c0_21] : memref<8x128xf32, #tpu.memory_space<vmem>>, vector<8x128xf32>
      tpu.vector_store %arg5[%c0_20, %c0_21], %27 {strides = array<i32>} : memref<8x128xf32, #tpu.memory_space<vmem>>, vector<8x128xf32>,
    } else {
    }
    %c0 = arith.constant 0 : index
    %c0_1 = arith.constant 0 : index
    %3 = vector.load %arg1[%c0, %c0_1] : memref<16x128xf32, #tpu.memory_space<vmem>>, vector<16x128xf32>
    %c0_2 = arith.constant 0 : index
    %c0_3 = arith.constant 0 : index
    %4 = vector.load %arg2[%c0_2, %c0_3] : memref<16x128xf32, #tpu.memory_space<vmem>>, vector<16x128xf32>
    %5 = arith.negf %3 : vector<16x128xf32>
    %6 = math.exp %5 : vector<16x128xf32>
    %cst = arith.constant 1.000000e+00 : f32
    %7 = vector.broadcast %cst : f32 to vector<16x128xf32>
    %8 = arith.addf %7, %6 : vector<16x128xf32>
    %9 = arith.divf %7, %8 : vector<16x128xf32>
    %10 = arith.mulf %9, %4 : vector<16x128xf32>
    %11 = arith.addf %9, %4 : vector<16x128xf32>
    %c0_4 = arith.constant 0 : index
    %c0_5 = arith.constant 0 : index
    %12 = vector.load %arg4[%c0_4, %c0_5] : memref<8x128xf32, #tpu.memory_space<vmem>>, vector<8x128xf32>
    %13 = vector.shape_cast %10 : vector<16x128xf32> to vector<2x8x128xf32>
    %cst_6 = arith.constant dense<0.000000e+00> : vector<8x128xf32>
    %14 = vector.multi_reduction <add>, %13, %cst_6 [0] : vector<2x8x128xf32> to vector<8x128xf32>
    %15 = arith.addf %12, %14 : vector<8x128xf32>
    %c0_7 = arith.constant 0 : index
    %c0_8 = arith.constant 0 : index
    %16 = vector.load %arg4[%c0_7, %c0_8] : memref<8x128xf32, #tpu.memory_space<vmem>>, vector<8x128xf32>
    tpu.vector_store %arg4[%c0_7, %c0_8], %15 {strides = array<i32>} : memref<8x128xf32, #tpu.memory_space<vmem>>, vector<8x128xf32>,
    %c0_9 = arith.constant 0 : index
    %c0_10 = arith.constant 0 : index
    %17 = vector.load %arg5[%c0_9, %c0_10] : memref<8x128xf32, #tpu.memory_space<vmem>>, vector<8x128xf32>
    %18 = vector.shape_cast %11 : vector<16x128xf32> to vector<2x8x128xf32>
    %cst_11 = arith.constant dense<0.000000e+00> : vector<8x128xf32>
    %19 = vector.multi_reduction <add>, %18, %cst_11 [0] : vector<2x8x128xf32> to vector<8x128xf32>
    %20 = arith.addf %17, %19 : vector<8x128xf32>
    %c0_12 = arith.constant 0 : index
    %c0_13 = arith.constant 0 : index
    %21 = vector.load %arg5[%c0_12, %c0_13] : memref<8x128xf32, #tpu.memory_space<vmem>>, vector<8x128xf32>
    tpu.vector_store %arg5[%c0_12, %c0_13], %20 {strides = array<i32>} : memref<8x128xf32, #tpu.memory_space<vmem>>, vector<8x128xf32>,
    %c0_i32_14 = arith.constant 0 : i32
    %22 = arith.cmpi eq, %arg0, %c0_i32_14 : i32
    %23 = arith.extui %22 : i1 to i32
    %c0_i32_15 = arith.constant 0 : i32
    %24 = arith.cmpi ne, %23, %c0_i32_15 : i32
    scf.if %24 {
      %c0_16 = arith.constant 0 : index
      %c0_17 = arith.constant 0 : index
      %25 = vector.load %arg4[%c0_16, %c0_17] : memref<8x128xf32, #tpu.memory_space<vmem>>, vector<8x128xf32>
      %26 = vector.shape_cast %25 : vector<8x128xf32> to vector<1x8x128xf32>
      %cst_18 = arith.constant dense<0.000000e+00> : vector<1xf32>
      %27 = vector.multi_reduction <add>, %26, %cst_18 [1, 2] : vector<1x8x128xf32> to vector<1xf32>
      %28 = vector.shape_cast %27 : vector<1xf32> to vector<1x1x1xf32>
      %29 = vector.extract %28[0, 0, 0] : f32 from vector<1x1x1xf32>
      %c0_19 = arith.constant 0 : index
      %c0_20 = arith.constant 0 : index
      %30 = vector.load %arg5[%c0_19, %c0_20] : memref<8x128xf32, #tpu.memory_space<vmem>>, vector<8x128xf32>
      %31 = vector.shape_cast %30 : vector<8x128xf32> to vector<1x8x128xf32>
      %cst_21 = arith.constant dense<0.000000e+00> : vector<1xf32>
      %32 = vector.multi_reduction <add>, %31, %cst_21 [1, 2] : vector<1x8x128xf32> to vector<1xf32>
      %33 = vector.shape_cast %32 : vector<1xf32> to vector<1x1x1xf32>
      %34 = vector.extract %33[0, 0, 0] : f32 from vector<1x1x1xf32>
      %cst_22 = arith.constant 1.000000e+00 : f32
      %35 = arith.addf %34, %cst_22 : f32
      %cst_23 = arith.constant 2.000000e+00 : f32
      %36 = arith.mulf %cst_23, %29 : f32
      %cst_24 = arith.constant 1.000000e+00 : f32
      %37 = arith.addf %36, %cst_24 : f32
      %38 = arith.divf %37, %35 : f32
      %cst_25 = arith.constant 1.000000e+00 : f32
      %39 = arith.subf %cst_25, %38 : f32
      %40 = vector.broadcast %39 : f32 to vector<1x1xf32>
      %c0_26 = arith.constant 0 : index
      %c0_27 = arith.constant 0 : index
      %41 = vector.load %arg3[%c0_26, %c0_27] : memref<1x1xf32, #tpu.memory_space<vmem>>, vector<1x1xf32>
      tpu.vector_store %arg3[%c0_26, %c0_27], %40 {strides = array<i32>} : memref<1x1xf32, #tpu.memory_space<vmem>>, vector<1x1xf32>,
    } else {
    }
    return
  }
  func.func @transform_0(%arg0: i32) -> (i32, i32) {
    %c0_i32 = arith.constant 0 : i32
    %c0_i32_0 = arith.constant 0 : i32
    return %arg0, %c0_i32 : i32, i32
  }
  func.func @transform_1(%arg0: i32) -> (i32, i32) {
    %c0_i32 = arith.constant 0 : i32
    %c0_i32_0 = arith.constant 0 : i32
    return %arg0, %c0_i32 : i32, i32
  }
  func.func @transform_2(%arg0: i32) -> (i32, i32) {
    %c0_i32 = arith.constant 0 : i32
    %c0_i32_0 = arith.constant 0 : i32
    %c0_i32_1 = arith.constant 0 : i32
    return %c0_i32, %c0_i32_0 : i32, i32
  }
}

</mosaic_0001>

<bundles_post_ra>
// kernel: tpu_custom_call.1
= control target key start
LH: loop header
LB: loop body
LE: loop exit
PB: predicated region body
PF: predicated region fallthrough
CT: control target
= control target key end

     0   :  { %7 = vsyncpa [#allocation5], 0  ;;  %s275_s0 = inlined_call_operand.hbm [shape: f32[16,128], index: 0, kind: input, shape index: {}]   ;;  %s276_s1 = inlined_call_operand.hbm [shape: f32[16,128], index: 1, kind: input, shape index: {}]   ;;  %s277_s2 = inlined_call_operand.hbm [shape: f32[1,1], index: 2, kind: output, shape index: {}]  }
   0x1   :  { %8 = vsyncpa [#allocation8], 0 }
   0x2   :  { %9 = vsyncpa [#allocation6], 0  ;;  %s219_s9 = smov [#allocation4]   ;;  %s147_s13 = scalar_lea.hbm %s275_s0, 256 }
   0x3   :  { %s15_s10 = sshll.u32 %s219_s9, 4  ;;  %p148_p0 = scmp.ne.s32.totalorder %s275_s0, %s147_s13  ;;  %s16_s10 = int_to_ptr.vmem [resolvable:$true] %s15_s10 }
   0x4   :  { %p151_p1 = scmp.lt.u32.totalorder %s147_s13, %s275_s0 }
   0x6   :  { %p153_p2 = pnand %p151_p1, %p148_p0 }
   0x8   :  { %156 = shalt.err (!%p153_p2)
}
   0x9   :  { %s157_s18 = scalar_lea.vmem %s16_s10, 256  ;;  %p162_p4 = scmp.lt.s32.totalorder %s16_s10, %s16_s10 }
   0xa   :  { %p158_p3 = scmp.ne.s32.totalorder %s16_s10, %s157_s18  ;;  %p163_p5 = scmp.lt.s32.totalorder %s157_s18, %s157_s18 }
   0xc   :  { %p164_p6 = por %p163_p5, %p162_p4 }
   0xe   :  { %p165_p7 = pnand %p164_p6, %p158_p3 }
  0x10   :  { %168 = shalt.err (!%p165_p7)
}
  0x11   :  { %s220_s19 = smov 128   ;;  %s221_s20 = smov 8  }
  0x12   :  { %21 = dma.hbm_to_vmem [thread:$0]  %s275_s0, 256, %s16_s10, [#allocation5], %s220_s19, %s220_s19, %s221_s20  }
  0x13   :  { %s222_s23 = smov [#allocation7]   ;;  %s169_s27 = scalar_lea.hbm %s276_s1, 256 }
  0x14   :  { %s27_s24 = sshll.u32 %s222_s23, 4  ;;  %p170_p8 = scmp.ne.s32.totalorder %s276_s1, %s169_s27  ;;  %s28_s24 = int_to_ptr.vmem [resolvable:$true] %s27_s24 }
  0x15   :  { %p173_p9 = scmp.lt.u32.totalorder %s169_s27, %s276_s1 }
  0x17   :  { %p175_p10 = pnand %p173_p9, %p170_p8 }
  0x19   :  { %178 = shalt.err (!%p175_p10)
}
  0x1a   :  { %s179_s4 = scalar_lea.vmem %s28_s24, 256  ;;  %p184_p12 = scmp.lt.s32.totalorder %s28_s24, %s28_s24 }
  0x1b   :  { %p180_p11 = scmp.ne.s32.totalorder %s28_s24, %s179_s4  ;;  %p185_p13 = scmp.lt.s32.totalorder %s179_s4, %s179_s4 }
  0x1d   :  { %p186_p0 = por %p185_p13, %p184_p12 }
  0x1f   :  { %p187_p1 = pnand %p186_p0, %p180_p11 }
  0x21   :  { %190 = shalt.err (!%p187_p1)
}
  0x22   :  { %33 = dma.hbm_to_vmem [thread:$0]  %s276_s1, 256, %s28_s24, [#allocation8], %s220_s19, %s220_s19, %s221_s20  }
  0x23   :  { %213 = dma.done.wait [#allocation5], 256  }
  0x24   :  { %214 = vsyncadd [#allocation5], 4294967040 }
  0x25   :  { %215 = dma.done.wait [#allocation8], 256  }
  0x26   :  { %216 = vsyncadd [#allocation8], 4294967040  ;;  %v46_v0 = vld [vmem:[#allocation4] sm:$0xff]  ;;  %v47_v1 = vld [vmem:[#allocation4 + $0x8] sm:$0xff]  ;;  %s223_s12 = smov [#allocation9]   ;;  %vm106_vm0 = vcmask 0  }
  0x27   :  { %v124_v2 = vmul.f32 -1.442695, %v46_v0  ;;  %v125_v3 = vmul.f32 -1.442695, %v47_v1  ;;  %v48_v8 = vld [vmem:[#allocation7] sm:$0xff]  ;;  %v49_v9 = vld [vmem:[#allocation7 + $0x8] sm:$0xff] }
  0x28   :  { %s114_s13 = sshll.u32 %s223_s12, 4  ;;  %s115_s13 = int_to_ptr.vmem [resolvable:$true] %s114_s13 }
  0x29   :  { %137 = vpow2.f32 %v124_v2  ;;  %s191_s15 = scalar_lea.vmem %s115_s13, 16  ;;  %s195_s16 = scalar_lea.vmem %s115_s13, 32 }
  0x2a   :  { %139 = vpow2.f32 %v125_v3  ;;  %p192_p2 = scmp.ne.s32.totalorder %s115_s13, %s191_s15  ;;  %p196_p3 = scmp.lt.s32.totalorder %s115_s13, %s115_s13 }
  0x2b   :  { %p197_p4 = scmp.lt.s32.totalorder %s195_s16, %s191_s15 }
  0x2d   :  { %p198_p5 = por %p197_p4, %p196_p3 }
  0x2f   :  { %p199_p6 = pnand %p198_p5, %p192_p2 }
  0x33   :  { %v138_v4 = vpop.eup %137 }
  0x34   :  { %v140_v5 = vpop.eup %139  ;;  %v56_v6 = vadd.f32 1.0, %v138_v4 }
  0x35   :  { %v57_v7 = vadd.f32 1.0, %v140_v5 }
  0x36   :  { %141 = vrcp.f32 %v56_v6 }
  0x37   :  { %143 = vrcp.f32 %v57_v7 }
  0x40   :  { %v142_v10 = vpop.eup %141 }
  0x41   :  { %v144_v11 = vpop.eup %143  ;;  %v62_v12 = vmul.f32 %v142_v10, %v48_v8  ;;  %v64_v14 = vadd.f32 %v142_v10, %v48_v8 }
  0x42   :  { %v63_v13 = vmul.f32 %v144_v11, %v49_v9  ;;  %v65_v15 = vadd.f32 %v144_v11, %v49_v9 }
  0x44   :  { %v67_v16 = vadd.f32 %v63_v13, %v62_v12  ;;  %v71_v17 = vadd.f32 %v65_v15, %v64_v14 }
  0x46   :  { %78 = vadd.xlane.f32.xlu0 %v67_v16 }
  0x4a   :  { %88 = vadd.xlane.f32.xlu0 %v71_v17 }
  0xd3   :  { %v79_v18 = vpop.xlane.xlu0 %78 }
  0xd4   :  { %v80_v19 = vrot.slane %v79_v18, 4 }
  0xd6   :  { %v81_v20 = vadd.f32 %v80_v19, %v79_v18 }
  0xd7   :  { %v89_v21 = vpop.xlane.xlu0 %88 }
  0xd8   :  { %v82_v22 = vrot.slane %v81_v20, 2  ;;  %v90_v23 = vrot.slane %v89_v21, 4 }
  0xda   :  { %v91_v24 = vadd.f32 %v90_v23, %v89_v21  ;;  %v83_v25 = vadd.f32 %v82_v22, %v81_v20 }
  0xdc   :  { %v92_v26 = vrot.slane %v91_v24, 2  ;;  %v84_v27 = vrot.slane %v83_v25, 1 }
  0xde   :  { %v93_v28 = vadd.f32 %v92_v26, %v91_v24  ;;  %v85_v29 = vadd.f32 %v84_v27, %v83_v25 }
  0xe0   :  { %126 = vpush %v85_v29  ;;  %v94_v30 = vrot.slane %v93_v28, 1 }
  0xe2   :  { %v95_v31 = vadd.f32 %v94_v30, %v93_v28 }
  0xe4   :  { %128 = vpush %v95_v31 }
 0x111   :  { %s127_s1 = spop %126 }
 0x112   :  { %s98_s8 = smul.f32 2.0, %s127_s1 }
 0x114   :  { %s99_s9 = sadd.f32 1.0, %s98_s8 }
 0x115   :  { %s129_s6 = spop %128 }
 0x116   :  { %s97_s7 = sadd.f32 1.0, %s129_s6 }
 0x118   :  { %v100_v32 = vstv %s97_s7 }
 0x119   :  { %145 = vrcp.f32 %v100_v32 }
 0x123   :  { %v146_v33 = vpop.eup %145 }
 0x124   :  { %130 = vpush %v146_v33 }
 0x155   :  { %s131_s10 = spop %130 }
 0x156   :  { %s103_s11 = smul.f32 %s131_s10, %s99_s9 }
 0x158   :  { %s104_s14 = ssub.f32 1.0, %s103_s11 }
 0x15a   :  { %v105_v34 = vstv %s104_s14 }
 0x15b   :  { %107 = vst.msk [vmem:[#allocation9] sm:$0x1] %vm106_vm0, %v105_v34 }
 0x15c   :  { %202 = shalt.err (!%p199_p6)
}
 0x15d   :  { %s203_s19 = scalar_lea.hbm %s277_s2, 16 }
 0x15e   :  { %p204_p7 = scmp.ne.s32.totalorder %s277_s2, %s203_s19  ;;  %p207_p8 = scmp.lt.u32.totalorder %s203_s19, %s277_s2 }
 0x160   :  { %p209_p9 = pnand %p207_p8, %p204_p7 }
 0x162   :  { %212 = shalt.err (!%p209_p9)
}
 0x163   :  { %117 = dma.vmem_to_hbm [thread:$0]  %s115_s13, 16, %s277_s2, [#allocation6]  }
 0x164   :  { %217 = dma.done.wait [#allocation6], 16  }
 0x165   :  { %218 = vsyncadd [#allocation6], 4294967280 }
 0x166   :  { %121 = vsyncpa [#allocation5], 1 }
 0x167   :  { %122 = vsyncpa [#allocation8], 1 }
 0x168   :  { %123 = vsyncpa [#allocation6], 1 }

</bundles_post_ra>
